<compile_context>
chip_gen: v5e
topology: v5e:2x2
jax: 0.10.0
libtpu: 0.0.40
codegen_flags: <defaults>
</compile_context>

<pallas_src>
import functools

import jax
import jax.numpy as jnp
from jax.experimental import pallas as pl
from jax.experimental.pallas import tpu as pltpu


LANE = 128
VMEM_LIMIT = 32 * 1024 * 1024  # safe on v5e/v6e (128 MiB) and v7x (64 MiB physical)


def _round_up(v, m):
    return (v + m - 1) // m * m


# ---------------------------------------------------------------------------
# Pallas kernel 1: tiled matmul + bias (+ pre/post ReLU, + fused residual add)
#   x (bf16) @ w (bf16) accumulated in f32 VMEM scratch across the K grid axis.
# ---------------------------------------------------------------------------
def _mm_kernel(*refs, pre_relu, post_relu, has_res):
    if has_res:
        x_ref, w_ref, b_ref, r_ref, o_ref, acc_ref = refs
    else:
        x_ref, w_ref, b_ref, o_ref, acc_ref = refs
        r_ref = None

    @pl.when(pl.program_id(2) == 0)
    def _init():
        acc_ref[...] = jnp.zeros_like(acc_ref)

    x = x_ref[...]
    if pre_relu:
        x = jnp.maximum(x, jnp.zeros_like(x))
    acc_ref[...] += jnp.dot(x, w_ref[...], preferred_element_type=jnp.float32)

    @pl.when(pl.program_id(2) == pl.num_programs(2) - 1)
    def _finalize():
        y = acc_ref[...] + b_ref[...].astype(jnp.float32)
        if post_relu:
            y = jnp.maximum(y, 0.0)
        if r_ref is not None:
            y = y + r_ref[...].astype(jnp.float32)
        o_ref[...] = y.astype(o_ref.dtype)


def _pick_tiles(M, N, K):
    # M tile: 256 for big problems (feeds the 256x256 MXU on v6e/v7x), otherwise
    # the whole (8-aligned) M.  N tile: 256 when it divides N, else 128.
    if M >= 256:
        tm, Mp = 256, _round_up(M, 256)
    else:
        Mp = _round_up(M, 8)
        tm = Mp
    tn = 256 if (N % 256 == 0) else 128
    tk = K
    for cand in (512, 384, 256, 128):
        if K % cand == 0:
            tk = cand
            break
    return tm, tn, tk, Mp


def matmul_bias(x2d, w2d, b2d, res2d=None, *, pre_relu=False, post_relu=False,
                out_dtype=jnp.bfloat16):
    M, K = x2d.shape
    K2, N = w2d.shape
    assert K2 == K and K % LANE == 0 and N % LANE == 0, (K, N)
    tm, tn, tk, Mp = _pick_tiles(M, N, K)
    if Mp != M:
        x2d = jnp.pad(x2d, ((0, Mp - M), (0, 0)))
        if res2d is not None:
            res2d = jnp.pad(res2d, ((0, Mp - M), (0, 0)))

    grid = (Mp // tm, N // tn, K // tk)
    in_specs = [
        pl.BlockSpec((tm, tk), lambda i, j, k: (i, k)),
        pl.BlockSpec((tk, tn), lambda i, j, k: (k, j)),
        pl.BlockSpec((1, tn), lambda i, j, k: (0, j)),
    ]
    args = [x2d, w2d, b2d]
    has_res = res2d is not None
    if has_res:
        in_specs.append(pl.BlockSpec((tm, tn), lambda i, j, k: (i, j)))
        args.append(res2d)

    out = pl.pallas_call(
        functools.partial(_mm_kernel, pre_relu=pre_relu, post_relu=post_relu,
                          has_res=has_res),
        out_shape=jax.ShapeDtypeStruct((Mp, N), out_dtype),
        grid=grid,
        in_specs=in_specs,
        out_specs=pl.BlockSpec((tm, tn), lambda i, j, k: (i, j)),
        scratch_shapes=[pltpu.VMEM((tm, tn), jnp.float32)],
        compiler_params=pltpu.CompilerParams(
            dimension_semantics=("parallel", "parallel", "arbitrary"),
            vmem_limit_bytes=VMEM_LIMIT,
        ),
    )(*args)
    return out[:M] if Mp != M else out


# ---------------------------------------------------------------------------
# Pallas kernel 2: fused LayerNorm(no affine) + QuantizeEMAReset (eval).
# Tiled over rows ("parallel"); per-tile partial loss / code counts are written
# into a lane-dense stats block and reduced (tiny) in the wrapper.
# Codebook is passed pre-transposed with precomputed ||cb||^2 (hoisted).
# ---------------------------------------------------------------------------
def _lnvq_kernel(x_ref, cbt_ref, cb_ref, cb2_ref, xd_ref, stats_ref, *,
                 d_true, kc_true, m_true, tm):
    tile = pl.program_id(0)
    x = x_ref[...].astype(jnp.float32)                       # (tm, Dp)

    # LayerNorm over the TRUE code_dim (padded channels are zero; keep them zero).
    ch_iota = jax.lax.broadcasted_iota(jnp.int32, x.shape, 1)
    ch_mask = (ch_iota < d_true).astype(jnp.float32)
    mu = jnp.sum(x, axis=-1, keepdims=True) * (1.0 / d_true)
    xc = (x - mu) * ch_mask
    var = jnp.sum(xc * xc, axis=-1, keepdims=True) * (1.0 / d_true)
    xn = xc * jax.lax.rsqrt(var + 1e-5)

    # Nearest-code lookup:  dist = ||x||^2 - 2 x cb^T + ||cb||^2
    cbt = cbt_ref[...]                                       # (Dp, Kcp)
    cb = cb_ref[...]                                         # (Kcp, Dp)
    cb2 = cb2_ref[...]                                       # (1, Kcp)
    kcp = cbt.shape[1]
    x2 = jnp.sum(xn * xn, axis=-1, keepdims=True)
    dist = x2 - 2.0 * jnp.dot(xn, cbt, preferred_element_type=jnp.float32) + cb2
    code_iota = jax.lax.broadcasted_iota(jnp.int32, dist.shape, 1)
    dist = jnp.where(code_iota < kc_true, dist, jnp.float32(1e30))  # mask padded codes

    min_d = jnp.min(dist, axis=-1, keepdims=True)
    idx = jnp.min(jnp.where(dist <= min_d, code_iota, kcp), axis=-1, keepdims=True)
    onehot = (code_iota == idx).astype(jnp.float32)          # (tm, Kcp)
    xd = jnp.dot(onehot, cb, preferred_element_type=jnp.float32)   # (tm, Dp)
    xd_ref[...] = xd.astype(xd_ref.dtype)

    # Partial commitment-loss sum and code counts (mask padded rows).
    row_iota = jax.lax.broadcasted_iota(jnp.int32, (x.shape[0], 1), 0) + tile * tm
    row_mask = (row_iota < m_true).astype(jnp.float32)       # (tm, 1)
    diff = (xn - xd) * row_mask
    loss_part = jnp.sum(diff * diff)
    counts = jnp.sum(onehot * row_mask, axis=0, keepdims=True)     # (1, Kcp)

    srow = jax.lax.broadcasted_iota(jnp.int32, (8, kcp), 0)
    stats = jnp.where(srow == 0, jnp.broadcast_to(counts, (8, kcp)),
                      jnp.where(srow == 1, loss_part, 0.0))
    stats_ref[...] = stats[None]


def layernorm_vq(x2d, cb_params):
    d_true = cb_params["code_dim"]
    kc_true = cb_params["nb_code"]
    M, Dp = x2d.shape
    tm = 256 if M >= 256 else _round_up(M, 8)
    Mp = _round_up(M, tm)
    if Mp != M:
        x2d = jnp.pad(x2d, ((0, Mp - M), (0, 0)))
    n_tiles = Mp // tm
    cbt, cb, cb2 = cb_params["cbt"], cb_params["cb"], cb_params["cb2"]
    kcp = cb.shape[0]

    xd, stats = pl.pallas_call(
        functools.partial(_lnvq_kernel, d_true=d_true, kc_true=kc_true,
                          m_true=M, tm=tm),
        out_shape=(jax.ShapeDtypeStruct((Mp, Dp), jnp.float32),
                   jax.ShapeDtypeStruct((n_tiles, 8, kcp), jnp.float32)),
        grid=(n_tiles,),
        in_specs=[
            pl.BlockSpec((tm, Dp), lambda i: (i, 0)),
            pl.BlockSpec((Dp, kcp), lambda i: (0, 0)),
            pl.BlockSpec((kcp, Dp), lambda i: (0, 0)),
            pl.BlockSpec((1, kcp), lambda i: (0, 0)),
        ],
        out_specs=(pl.BlockSpec((tm, Dp), lambda i: (i, 0)),
                   pl.BlockSpec((1, 8, kcp), lambda i: (i, 0, 0))),
        compiler_params=pltpu.CompilerParams(
            dimension_semantics=("parallel",),
            vmem_limit_bytes=VMEM_LIMIT,
        ),
    )(x2d, cbt, cb, cb2)

    counts = jnp.sum(stats[:, 0, :kc_true], axis=0)
    loss = jnp.sum(stats[:, 1, 0]) / (M * d_true)
    prob = counts / M
    perplexity = jnp.exp(-jnp.sum(prob * jnp.log(prob + 1e-7)))
    return xd[:M], loss, perplexity


# ---------------------------------------------------------------------------
# Conv1d = bf16 im2col (JAX glue) + tiled Pallas matmul (k=1 convs skip im2col,
# and the residual add of a ResConv1DBlock is fused into the matmul epilogue).
# ---------------------------------------------------------------------------
def conv1d(x, layer, *, pre_relu=False, post_relu=False, out_dtype=jnp.bfloat16,
           res=None):
    # x: (B, T, Cin_pad) bf16 channels-last; layer holds lane-dense (K*Cin_pad, Cout_pad)
    # bf16 weights and (1, Cout_pad) f32 bias, plus conv metadata.
    B, T, Cin = x.shape
    k, stride, pad, dil = layer["k"], layer["stride"], layer["pad"], layer["dil"]
    w2d, b2d = layer["w"], layer["b"]
    if k == 1 and stride == 1 and pad == 0:
        xcol = x.reshape(B * T, Cin)
        t_out = T
    else:
        xp = jnp.pad(x, ((0, 0), (pad, pad), (0, 0)))
        tp = T + 2 * pad
        t_out = (tp - dil * (k - 1) - 1) // stride + 1
        taps = []
        for kk in range(k):
            start = kk * dil
            limit = start + stride * (t_out - 1) + 1
            taps.append(jax.lax.slice(xp, (0, start, 0), (B, limit, Cin), (1, stride, 1)))
        xcol = jnp.stack(taps, axis=2).reshape(B * t_out, k * Cin)
    res2d = None if res is None else res.reshape(B * t_out, res.shape[-1])
    y = matmul_bias(xcol, w2d, b2d, res2d, pre_relu=pre_relu, post_relu=post_relu,
                    out_dtype=out_dtype)
    return y.reshape(B, t_out, w2d.shape[1])


# ---------------------------------------------------------------------------
# Deterministic parameter init + one-time preprocessing (pad channels to 128,
# transpose weights to (K*Cin_pad, Cout_pad) bf16, bias to (1, Cout_pad) f32,
# codebook pre-transposed with precomputed ||cb||^2).
# ---------------------------------------------------------------------------
def _init_conv_layer(key, cout, cin, k, *, stride=1, pad=0, dil=1):
    cin_p, cout_p = _round_up(cin, LANE), _round_up(cout, LANE)
    k1, k2 = jax.random.split(key)
    bound = 1.0 / ((cin * k) ** 0.5)
    w = jax.random.uniform(k1, (cout, cin, k), jnp.float32, -bound, bound)
    b = jax.random.uniform(k2, (cout,), jnp.float32, -bound, bound)
    w_p = jnp.zeros((cout_p, cin_p, k), jnp.float32).at[:cout, :cin, :].set(w)
    w2d = jnp.transpose(w_p, (2, 1, 0)).reshape(k * cin_p, cout_p).astype(jnp.bfloat16)
    b2d = jnp.zeros((1, cout_p), jnp.float32).at[:, :cout].set(b)
    return dict(w=w2d, b=b2d, k=k, stride=stride, pad=pad, dil=dil)


def make_encoder_params(key, in_dim, out_emb, width, down_t, depth, dgr):
    keys = iter(jax.random.split(key, 2 + down_t * (1 + 2 * depth)))
    p = {"conv_in": _init_conv_layer(next(keys), width, in_dim, 3, pad=1), "blocks": []}
    for _ in range(down_t):
        down = _init_conv_layer(next(keys), width, width, 4, stride=2, pad=1)
        res = []
        for d in range(depth):
            dil = dgr ** d
            res.append((_init_conv_layer(next(keys), width, width, 3, pad=dil, dil=dil),
                        _init_conv_layer(next(keys), width, width, 1)))
        p["blocks"].append({"down": down, "res": res})
    p["conv_out"] = _init_conv_layer(next(keys), out_emb, width, 3, pad=1)
    return p


def make_decoder_params(key, out_dim, out_emb, width, down_t, depth, dgr):
    keys = iter(jax.random.split(key, 3 + down_t * (1 + 2 * depth)))
    p = {"conv_in": _init_conv_layer(next(keys), width, out_emb, 3, pad=1), "blocks": []}
    for _ in range(down_t):
        res = []
        for d in range(depth):
            dil = dgr ** (depth - 1 - d)            # reverse_dilation=True
            res.append((_init_conv_layer(next(keys), width, width, 3, pad=dil, dil=dil),
                        _init_conv_layer(next(keys), width, width, 1)))
        up_conv = _init_conv_layer(next(keys), width, width, 3, pad=1)
        p["blocks"].append({"res": res, "up_conv": up_conv})
    p["conv_out1"] = _init_conv_layer(next(keys), width, width, 3, pad=1)
    p["conv_out2"] = _init_conv_layer(next(keys), out_dim, width, 3, pad=1)
    return p


def make_codebook_params(key, nb_code, code_dim):
    kcp, dp = _round_up(nb_code, LANE), _round_up(code_dim, LANE)
    cb_true = (0.02 * jax.random.normal(key, (nb_code, code_dim))).astype(jnp.float32)
    cb = jnp.zeros((kcp, dp), jnp.float32).at[:nb_code, :code_dim].set(cb_true)
    cbt = jnp.transpose(cb)                                       # (Dp, Kcp)
    cb2 = jnp.transpose(jnp.sum(cb * cb, axis=-1, keepdims=True))  # (1, Kcp)
    return dict(cb=cb, cbt=cbt, cb2=cb2, nb_code=nb_code, code_dim=code_dim)


# ---------------------------------------------------------------------------
# Encoder / Decoder / full forward (text=None branch)
# ---------------------------------------------------------------------------
def encoder_fwd(p, x):
    h = conv1d(x, p["conv_in"], post_relu=True)
    for blk in p["blocks"]:
        h = conv1d(h, blk["down"])                                 # k=4, s=2, p=1
        for (l1, l2) in blk["res"]:                                # Resnet1D block
            r = conv1d(h, l1, pre_relu=True)
            h = conv1d(r, l2, pre_relu=True, res=h)                # fused residual add
    return conv1d(h, p["conv_out"], out_dtype=jnp.float32)


def decoder_fwd(p, x):
    h = conv1d(x, p["conv_in"], post_relu=True)
    for blk in p["blocks"]:
        for (l1, l2) in blk["res"]:
            r = conv1d(h, l1, pre_relu=True)
            h = conv1d(r, l2, pre_relu=True, res=h)
        h = jnp.repeat(h, 2, axis=1)                               # Upsample(2, nearest)
        h = conv1d(h, blk["up_conv"])
    h = conv1d(h, p["conv_out1"], post_relu=True)
    return conv1d(h, p["conv_out2"], out_dtype=jnp.float32)


def human_vqvae_forward(params, x):
    # x: (B, T, C_motion) f32 (torch (N, T, nfeats); preprocess permute folded into layout)
    B, T, C = x.shape
    c_pad = params["c_motion_pad"]
    x_p = jnp.zeros((B, T, c_pad), jnp.bfloat16).at[:, :, :C].set(x.astype(jnp.bfloat16))

    h = encoder_fwd(params["encoder"], x_p)                 # (B, T/2**down_t, code_dim_pad) f32
    Bh, Te, Dp = h.shape
    xd, loss, perplexity = layernorm_vq(h.reshape(Bh * Te, Dp), params["codebook"])
    xq = xd.reshape(Bh, Te, Dp).astype(jnp.bfloat16)
    # TODO(synk): VanillaDemasker not provided; inference path passes quantized codes through.
    dec = decoder_fwd(params["decoder"], xq)                # (B, T, c_motion_pad) f32
    dec = dec[:, :, :C]
    x_out = jnp.transpose(dec, (0, 2, 1))                   # torch x_decoder layout (B, C, T)
    return x_out, loss, perplexity


# ---------------------------------------------------------------------------
if __name__ == "__main__":
    # Small but architecture-consistent configuration.
    B, T = 2, 16
    C_MOTION = 263          # args.dataset_name != 'kit'
    WIDTH = 64              # (shrunk from 512; padded to 128 internally)
    CODE_DIM = 64
    OUT_EMB = 64
    NB_CODE = 64
    DOWN_T = 2
    DEPTH = 2
    DGR = 3                 # dilation_growth_rate

    key = jax.random.PRNGKey(0)
    k_enc, k_dec, k_cb, k_x = jax.random.split(key, 4)
    params = {
        "encoder": make_encoder_params(k_enc, C_MOTION, OUT_EMB, WIDTH, DOWN_T, DEPTH, DGR),
        "decoder": make_decoder_params(k_dec, C_MOTION, OUT_EMB, WIDTH, DOWN_T, DEPTH, DGR),
        "codebook": make_codebook_params(k_cb, NB_CODE, CODE_DIM),
        "c_motion_pad": _round_up(C_MOTION, LANE),
    }
    x = jax.random.normal(k_x, (B, T, C_MOTION), dtype=jnp.float32)

    x_out, loss, perplexity = human_vqvae_forward(params, x)
    jax.block_until_ready((x_out, loss, perplexity))

    assert x_out.shape == (B, C_MOTION, T), x_out.shape
    assert loss.shape == () and perplexity.shape == ()
    print("KERNEL_OK")
</pallas_src>

<mosaic_0001>
module attributes {stable_mosaic.version = 11 : i64} {
  func.func @_mm_kernel(%arg0: i32, %arg1: i32, %arg2: i32, %arg3: memref<32x384xbf16, #tpu.memory_space<vmem>>, %arg4: memref<384x128xbf16, #tpu.memory_space<vmem>>, %arg5: memref<1x128xf32, #tpu.memory_space<vmem>>, %arg6: memref<32x128xbf16, #tpu.memory_space<vmem>>, %arg7: memref<32x128xf32, #tpu.memory_space<vmem>>) attributes {dimension_semantics = [#tpu.dimension_semantics<parallel>, #tpu.dimension_semantics<parallel>, #tpu.dimension_semantics<arbitrary>], iteration_bounds = array<i64: 1, 1, 3>, scalar_prefetch = 0 : i64, scratch_operands = 1 : i64, tpu.core_type = #tpu.core_type<tc>, window_params = [{transform_indices = @transform_0, window_bounds = array<i64: 32, 384>}, {transform_indices = @transform_1, window_bounds = array<i64: 384, 128>}, {transform_indices = @transform_2, window_bounds = array<i64: 1, 128>}, {transform_indices = @transform_3, window_bounds = array<i64: 32, 128>}]} {
    %c0_i32 = arith.constant 0 : i32
    %0 = arith.cmpi eq, %arg2, %c0_i32 : i32
    %1 = arith.extui %0 : i1 to i32
    %c0_i32_0 = arith.constant 0 : i32
    %2 = arith.cmpi ne, %1, %c0_i32_0 : i32
    scf.if %2 {
      %cst_9 = arith.constant 0.000000e+00 : f32
      %12 = vector.broadcast %cst_9 : f32 to vector<32x128xf32>
      %c0_10 = arith.constant 0 : index
      %c0_11 = arith.constant 0 : index
      %13 = vector.load %arg7[%c0_10, %c0_11] : memref<32x128xf32, #tpu.memory_space<vmem>>, vector<32x128xf32>
      tpu.vector_store %arg7[%c0_10, %c0_11], %12 {strides = array<i32>} : memref<32x128xf32, #tpu.memory_space<vmem>>, vector<32x128xf32>,
    } else {
    }
    %c0 = arith.constant 0 : index
    %c0_1 = arith.constant 0 : index
    %3 = vector.load %arg3[%c0, %c0_1] : memref<32x384xbf16, #tpu.memory_space<vmem>>, vector<32x384xbf16>
    %c0_2 = arith.constant 0 : index
    %c0_3 = arith.constant 0 : index
    %4 = vector.load %arg7[%c0_2, %c0_3] : memref<32x128xf32, #tpu.memory_space<vmem>>, vector<32x128xf32>
    %c0_4 = arith.constant 0 : index
    %c0_5 = arith.constant 0 : index
    %5 = vector.load %arg4[%c0_4, %c0_5] : memref<384x128xbf16, #tpu.memory_space<vmem>>, vector<384x128xbf16>
    %cst = arith.constant dense<0.000000e+00> : vector<32x128xf32>
    %6 = tpu.matmul %3, %5, %cst {dimension_numbers = #tpu.dot_dimension_numbers<[1], [0], [0], [1], [0, 0, 1, 1], [], []>} : vector<32x384xbf16>, vector<384x128xbf16>, vector<32x128xf32> -> vector<32x128xf32>
    %7 = arith.addf %4, %6 : vector<32x128xf32>
    %c0_6 = arith.constant 0 : index
    %c0_7 = arith.constant 0 : index
    %8 = vector.load %arg7[%c0_6, %c0_7] : memref<32x128xf32, #tpu.memory_space<vmem>>, vector<32x128xf32>
    tpu.vector_store %arg7[%c0_6, %c0_7], %7 {strides = array<i32>} : memref<32x128xf32, #tpu.memory_space<vmem>>, vector<32x128xf32>,
    %c2_i32 = arith.constant 2 : i32
    %9 = arith.cmpi eq, %arg2, %c2_i32 : i32
    %10 = arith.extui %9 : i1 to i32
    %c0_i32_8 = arith.constant 0 : i32
    %11 = arith.cmpi ne, %10, %c0_i32_8 : i32
    scf.if %11 {
      %c0_9 = arith.constant 0 : index
      %c0_10 = arith.constant 0 : index
      %12 = vector.load %arg7[%c0_9, %c0_10] : memref<32x128xf32, #tpu.memory_space<vmem>>, vector<32x128xf32>
      %c0_11 = arith.constant 0 : index
      %c0_12 = arith.constant 0 : index
      %13 = vector.load %arg5[%c0_11, %c0_12] : memref<1x128xf32, #tpu.memory_space<vmem>>, vector<1x128xf32>
      %14 = vector.broadcast %13 : vector<1x128xf32> to vector<32x128xf32>
      %15 = arith.addf %12, %14 : vector<32x128xf32>
      %cst_13 = arith.constant 0.000000e+00 : f32
      %16 = vector.broadcast %cst_13 : f32 to vector<32x128xf32>
      %17 = arith.maximumf %15, %16 : vector<32x128xf32>
      %18 = arith.truncf %17 : vector<32x128xf32> to vector<32x128xbf16>
      %c0_14 = arith.constant 0 : index
      %c0_15 = arith.constant 0 : index
      %19 = vector.load %arg6[%c0_14, %c0_15] : memref<32x128xbf16, #tpu.memory_space<vmem>>, vector<32x128xbf16>
      tpu.vector_store %arg6[%c0_14, %c0_15], %18 {strides = array<i32>} : memref<32x128xbf16, #tpu.memory_space<vmem>>, vector<32x128xbf16>,
    } else {
    }
    return
  }
  func.func @transform_0(%arg0: i32, %arg1: i32, %arg2: i32) -> (i32, i32) {
    %c0_i32 = arith.constant 0 : i32
    return %arg0, %arg2 : i32, i32
  }
  func.func @transform_1(%arg0: i32, %arg1: i32, %arg2: i32) -> (i32, i32) {
    %c0_i32 = arith.constant 0 : i32
    return %arg2, %arg1 : i32, i32
  }
  func.func @transform_2(%arg0: i32, %arg1: i32, %arg2: i32) -> (i32, i32) {
    %c0_i32 = arith.constant 0 : i32
    %c0_i32_0 = arith.constant 0 : i32
    return %c0_i32, %arg1 : i32, i32
  }
  func.func @transform_3(%arg0: i32, %arg1: i32, %arg2: i32) -> (i32, i32) {
    %c0_i32 = arith.constant 0 : i32
    return %arg0, %arg1 : i32, i32
  }
}

</mosaic_0001>

<bundles_post_ra>
// kernel: tpu_custom_call.1
= control target key start
LH: loop header
LB: loop body
LE: loop exit
PB: predicated region body
PF: predicated region fallthrough
CT: control target
= control target key end

     0   :  { %8 = vsyncpa [#allocation4], 0  ;;  %s1323_s0 = inlined_call_operand.hbm [shape: bf16[32,1152], index: 0, kind: input, shape index: {}]   ;;  %s1324_s1 = inlined_call_operand.hbm [shape: bf16[1152,128], index: 1, kind: input, shape index: {}]   ;;  %s1325_s2 = inlined_call_operand.vmem [shape: f32[1,128], index: 2, kind: input, shape index: {}]   ;;  %s1326_s3 = inlined_call_operand.hbm [shape: bf16[32,128], index: 3, kind: output, shape index: {}]  }
   0x1   :  { %10 = vsyncpa [#allocation4 + $0x1], 0 }
   0x2   :  { %11 = vsyncpa [#allocation7], 0 }
   0x3   :  { %13 = vsyncpa [#allocation7 + $0x1], 0 }
   0x4   :  { %14 = vsyncpa [#allocation5], 0  ;;  %s1172_s12 = smov 0   ;;  %s1174_s13 = smov 0  }
   0x5   :  { %s1176_s14 = smov 0   ;;  %s1178_s15 = smov 0  }
   0x6   :  { %s1180_s16 = smov 0   ;;  %s1182_s17 = smov 0  }
   0x7 LB: > { %s1327_s18 = sadd.s32 4294967295, %s1141_s17   ;;  %s32_s19 = sadd.s32 1, %s1137_s16  ;;  %s1141_s17 = sphi %s1182_s17, %s20_s17   ;;  %s1137_s16 = sphi %s1180_s16, %s1335_s16   ;;  %s1133_s15 = sphi %s1178_s15, %s1334_s15   ;;  %s1129_s14 = sphi %s1176_s14, %s1333_s14   ;;  %s1125_s13 = sphi %s1174_s13, %s1332_s13   ;;  %s1121_s12 = sphi %s1172_s12, %s1331_s12  }
   0x8   : > { %p33_p0 = scmp.ge.s32.totalorder %s32_s19, 3  ;;  %s48_s20 = sadd.s32 1, %s1129_s14 }
   0x9   : > { %p55_p1 = scmp.ne.s32.totalorder %s1129_s14, %s1125_s13  ;;  %p56_p2 = scmp.eq.s32.totalorder %s1141_s17, 0 }
   0xa   : > { %s1337_s19 = smov (%p33_p0, %s32_s19), 0  ;;  %p61_p4 = scmp.ne.s32.totalorder %s1125_s13, %s1121_s12 }
   0xb   : > { %p57_p3 = por %p56_p2, %p55_p1  ;;  %s44_s21 = ssub.s32 %s1137_s16, %s1337_s19 }
   0xc   : > { %p62_p5 = scmp.eq.s32.totalorder %s1327_s18, 0  ;;  %p46_p6 = scmp.eq.s32.totalorder %s44_s21, 0 }
   0xd   : > { %p934_p8 = scmp.lt.s32.totalorder %s1141_s17, 3  ;;  %s1222_s24 = sand.u32 1, %s1129_s14  }
   0xe   : > { %p1213_p7 = por %p62_p5, %p61_p4  ;;  %s864_s25 = smul.u32 12, %s1137_s16 }
   0xf   : > { %s1219_s23 = scalar_select %p46_p6, %s1129_s14, %s48_s20  }
  0x10   : > { %s915_s26 = smul.u32 48, %s1222_s24  ;;  %s185_s29 = scalar_lea.hbm %s1323_s0, %s864_s25 }
  0x11   : > { %p1229_p9 = pnand %p934_p8, %p57_p3  ;;  %s186_s4 = sshll.u32 %s185_s29, 4  ;;  %s187_s4 = int_to_ptr.hbm [resolvable:$true] %s186_s4 }
  0x12   : > { %s177_s5 = scalar_lea.vmem [#allocation3], %s915_s26  ;;  %p737_p10 = scmp.ge.s32.totalorder %s1141_s17, 1 }
  0x13   : > { %s188_s6 = sshll.u32 %s177_s5, 4  ;;  %s174_s7 = scalar_lea.sflag [#allocation4], %s1222_s24  ;;  %s189_s6 = int_to_ptr.vmem [resolvable:$true] %s188_s6 }
  0x14   : > { %s1143_s8 = smov 576   ;;  %s1144_s9 = smov 192  }
  0x15   : > { %s1145_s10 = smov 12   ;;  %p219_p11 = scmp.lt.s32.totalorder %s1141_s17, 4 }
  0x16   : > { %930 = dma.hbm_to_vmem [thread:$0]  (!%p1229_p9), %s187_s4, 768, %s189_s6, %s174_s7, %s1143_s8, %s1144_s9, %s1145_s10  }
  0x17   : > { %s916_s11 = smul.u32 192, %s1222_s24  ;;  %p220_p12 = pnand %p737_p10, %p219_p11 }
  0x18   : > { %s865_s12 = smul.u32 192, %s1137_s16  ;;  %s199_s29 = scalar_lea.sflag [#allocation7], %s1222_s24 }
  0x19   : > { %s202_s26 = scalar_lea.vmem [#allocation6], %s916_s11  ;;  %s1146_s5 = smov 64  }
  0x1a   : > { %s208_s25 = scalar_lea.hbm %s1324_s1, %s865_s12  ;;  %s211_s27 = sshll.u32 %s202_s26, 4  ;;  %s212_s27 = int_to_ptr.vmem [resolvable:$true] %s211_s27 }
  0x1b   : > { %s209_s28 = sshll.u32 %s208_s25, 4  ;;  %s1147_s18 = smov 4   ;;  %s210_s28 = int_to_ptr.hbm [resolvable:$true] %s209_s28 }
  0x1c   : > { %933 = dma.hbm_to_vmem [thread:$0]  (!%p1229_p9), %s210_s28, 3072, %s212_s27, %s199_s29, %s1146_s5, %s1146_s5, %s1147_s18  }
  0x1d   : > { %223 = sbr.rel (%p220_p12) target bundleno = 267 (0x10b), region = 32  ;;  %s225_s4 = sand.u32 (!%p220_p12), 1, %s1125_s13  }
  0x1e   : > { %s917_s6 = smul.u32 (!%p220_p12), 48, %s225_s4  ;;  %s226_s7 = scalar_lea.sflag (!%p220_p12), [#allocation4], %s225_s4 }
  0x20   : > { %s1247_s8 = scalar_lea.vmem (!%p220_p12), [#allocation3], %s917_s6 }
  0x22   : > { %1108 = dma.done.wait (%p1213_p7), %s226_s7, 768  }
  0x23   : > { %1110 = vsyncadd (%p1213_p7), %s226_s7, 4294966528  ;;  %s918_s9 = smul.u32 192, %s225_s4  ;;  %s236_s24 = scalar_lea.sflag [#allocation7], %s225_s4 }
  0x25   : > { %s1253_s10 = scalar_lea.vmem [#allocation6], %s918_s9 }
  0x26   : > { %1112 = dma.done.wait (%p1213_p7), %s236_s24, 3072  }
  0x27   : > { %1114 = vsyncadd (%p1213_p7), %s236_s24, 4294964224  ;;  %p738_p13 = scmp.ne.s32.totalorder %s1133_s15, 0 }
  0x29   : > { %276 = sbr.rel (%p738_p13) target bundleno = 51 (0x33), region = 44 }
  0x2e   : > { %v1148_v0 = vmov 0.0  }
  0x2f   : > { %277 = vst [vmem:[#allocation2 + $0x10] sm:$0xff] %v1148_v0 }
  0x30   : > { %278 = vst [vmem:[#allocation2] sm:$0xff] %v1148_v0 }
  0x31   : > { %279 = vst [vmem:[#allocation2 + $0x18] sm:$0xff] %v1148_v0 }
  0x32   : > { %280 = vst [vmem:[#allocation2 + $0x8] sm:$0xff] %v1148_v0 }
  0x33 PF: > { %v879_v1 = vld [vmem:[%s1253_s10 + $0x38] sm:$0xff]  ;;  %v878_v4 = vld [vmem:[%s1253_s10 + $0x30] sm:$0xff]  ;;  %v877_v7 = vld [vmem:[%s1253_s10 + $0x28] sm:$0xff]  ;;  %p859_p0 = scmp.ne.s32.totalorder %s1133_s15, 2 }
  0x34   : > { %v887_v2 = vld [vmem:[%s1253_s10 + $0x78] sm:$0xff]  ;;  %517 = vmatpush.bf16.msra.mxu0 %v879_v1  ;;  %v886_v5 = vld [vmem:[%s1253_s10 + $0x70] sm:$0xff]  ;;  %907 = vmatpush.bf16.msra.mxu3 %v879_v1  ;;  %v885_v8 = vld [vmem:[%s1253_s10 + $0x68] sm:$0xff] }
  0x35   : > { %v895_v3 = vld [vmem:[%s1253_s10 + $0xb8] sm:$0xff]  ;;  %536 = vmatpush.bf16.msra.mxu1 %v887_v2  ;;  %v894_v6 = vld [vmem:[%s1253_s10 + $0xb0] sm:$0xff]  ;;  %v893_v9 = vld [vmem:[%s1253_s10 + $0xa8] sm:$0xff] }
  0x36   : > { %555 = vmatpush.bf16.msra.mxu2 %v895_v3  ;;  %v876_v10 = vld [vmem:[%s1253_s10 + $0x20] sm:$0xff]  ;;  %v875_v13 = vld [vmem:[%s1253_s10 + $0x18] sm:$0xff]  ;;  %v874_v16 = vld [vmem:[%s1253_s10 + $0x10] sm:$0xff] }
  0x37   : > { %v884_v11 = vld [vmem:[%s1253_s10 + $0x60] sm:$0xff]  ;;  %v883_v14 = vld [vmem:[%s1253_s10 + $0x58] sm:$0xff]  ;;  %v882_v17 = vld [vmem:[%s1253_s10 + $0x50] sm:$0xff] }
  0x38   : > { %518 = vmatpush.bf16.msra.mxu0 %v878_v4  ;;  %908 = vmatpush.bf16.msra.mxu3 %v878_v4  ;;  %v892_v12 = vld [vmem:[%s1253_s10 + $0xa0] sm:$0xff]  ;;  %v891_v15 = vld [vmem:[%s1253_s10 + $0x98] sm:$0xff]  ;;  %v890_v18 = vld [vmem:[%s1253_s10 + $0x90] sm:$0xff] }
  0x39   : > { %537 = vmatpush.bf16.msra.mxu1 %v886_v5  ;;  %v873_v19 = vld [vmem:[%s1253_s10 + $0x8] sm:$0xff]  ;;  %v872_v22 = vld [vmem:[%s1253_s10] sm:$0xff]  ;;  %v289_v46 = vld [vmem:[#allocation2 + $0x10] sm:$0xff] }
  0x3a   : > { %556 = vmatpush.bf16.msra.mxu2 %v894_v6  ;;  %v881_v20 = vld [vmem:[%s1253_s10 + $0x48] sm:$0xff]  ;;  %v880_v23 = vld [vmem:[%s1253_s10 + $0x40] sm:$0xff]  ;;  %v291_v60 = vld [vmem:[#allocation2 + $0x18] sm:$0xff] }
  0x3b   : > { %v889_v21 = vld [vmem:[%s1253_s10 + $0x88] sm:$0xff]  ;;  %v888_v24 = vld [vmem:[%s1253_s10 + $0x80] sm:$0xff] }
  0x3c   : > { %519 = vmatpush.bf16.msra.mxu0 %v877_v7  ;;  %909 = vmatpush.bf16.msra.mxu3 %v877_v7  ;;  %v741_v25 = vld [vmem:[%s1247_s8] sm:$0xf]  ;;  %v867_v26 = vld [vmem:[%s1247_s8 + $0x8] sm:$0xf0]  ;;  %v866_v27 = vld [vmem:[%s1247_s8 + $0x4] sm:$0xf] }
  0x3d   : > { %538 = vmatpush.bf16.msra.mxu1 %v885_v8  ;;  %v743_v28 = vld [vmem:[%s1247_s8 + $0xc] sm:$0xf0]  ;;  %v749_v29 = vld [vmem:[%s1247_s8 + $0x8] sm:$0xf]  ;;  %v868_v30 = vld [vmem:[%s1247_s8 + $0x10] sm:$0xf0]  ;;  %v742_v33 = vor.u32 %v867_v26, %v741_v25 }
  0x3e   : > { %557 = vmatpush.bf16.msra.mxu2 %v893_v9  ;;  %v753_v31 = vld [vmem:[%s1247_s8 + $0x18] sm:$0xf]  ;;  %v870_v32 = vld [vmem:[%s1247_s8 + $0x20] sm:$0xf0]  ;;  %v746_v34 = vor.u32 %v866_v27, %v743_v28  ;;  %v750_v35 = vor.u32 %v868_v30, %v749_v29  ;;  %v869_v37 = vld [vmem:[%s1247_s8 + $0x1c] sm:$0xf] }
  0x3f   : > { %v754_v36 = vor.u32 %v870_v32, %v753_v31  ;;  %v755_v38 = vld [vmem:[%s1247_s8 + $0x24] sm:$0xf0]  ;;  %v761_v39 = vld [vmem:[%s1247_s8 + $0x20] sm:$0xf]  ;;  %v871_v40 = vld [vmem:[%s1247_s8 + $0x28] sm:$0xf0] }
  0x40   : > { %520 = vmatpush.bf16.msra.mxu0 %v876_v10  ;;  %910 = vmatpush.bf16.msra.mxu3 %v876_v10  ;;  %v758_v41 = vor.u32 %v869_v37, %v755_v38  ;;  %v762_v42 = vor.u32 %v871_v40, %v761_v39  ;;  %v290_v53 = vld [vmem:[#allocation2] sm:$0xff]  ;;  %v292_v3 = vld [vmem:[#allocation2 + $0x8] sm:$0xff] }
  0x41   : > { %539 = vmatpush.bf16.msra.mxu1 %v884_v11 }
  0x42   : > { %558 = vmatpush.bf16.msra.mxu2 %v892_v12 }
  0x44   : > { %521 = vmatpush.bf16.msra.mxu0 %v875_v13  ;;  %911 = vmatpush.bf16.msra.mxu3 %v875_v13 }
  0x45   : > { %540 = vmatpush.bf16.msra.mxu1 %v883_v14 }
  0x46   : > { %559 = vmatpush.bf16.msra.mxu2 %v891_v15 }
  0x48   : > { %522 = vmatpush.bf16.msra.mxu0 %v874_v16  ;;  %912 = vmatpush.bf16.msra.mxu3 %v874_v16 }
  0x49   : > { %541 = vmatpush.bf16.msra.mxu1 %v882_v17 }
  0x4a   : > { %560 = vmatpush.bf16.msra.mxu2 %v890_v18 }
  0x4c   : > { %523 = vmatpush.bf16.msra.mxu0 %v873_v19  ;;  %913 = vmatpush.bf16.msra.mxu3 %v873_v19 }
  0x4d   : > { %542 = vmatpush.bf16.msra.mxu1 %v881_v20 }
  0x4e   : > { %561 = vmatpush.bf16.msra.mxu2 %v889_v21 }
  0x50   : > { %524 = vmatpush.bf16.msra.mxu0 %v872_v22  ;;  %914 = vmatpush.bf16.msra.mxu3 %v872_v22 }
  0x51   : > { %543 = vmatpush.bf16.msra.mxu1 %v880_v23 }
  0x52   : > { %562 = vmatpush.bf16.msra.mxu2 %v888_v24 }
  0x53   : > { %525 = vmatmul.bf16.vlgmr.msra.gmra.mxu0 %v742_v33  ;;  %530 = vmatmul.bf16.vlgmr.msra.gmra.mxu3 %v754_v36 }
  0x54   : > { %544 = vmatmul.bf16.vlgmr.msra.gmra.mxu1 %v746_v34 }
  0x55   : > { %563 = vmatmul.bf16.vlgmr.msra.gmra.mxu2 %v750_v35 }
  0x64   : > { %549 = vmatmul.bf16.gmra.mxu1 %v758_v41 }
  0x65   : > { %568 = vmatmul.bf16.gmra.mxu2 %v762_v42 }
  0xd0   : > { %v526_v44 = vpop.f32.mrf.mxu0 }
  0xd1   : > { %v545_v43 = vpop.f32.mrf.mxu1 }
  0xd2   : > { %v546_v45 = vadd.f32 %v545_v43, %v526_v44 }
  0xd6   : > { %v531_v58 = vpop.f32.mrf.mxu3 }
  0xd8   : > { %v564_v47 = vpop.f32.mrf.mxu2  ;;  %v528_v51 = vpop.f32.mrf.mxu0 }
  0xd9   : > { %v565_v48 = vadd.f32 %v564_v47, %v546_v45  ;;  %v547_v49 = vpop.f32.mrf.mxu1 }
  0xda   : > { %v548_v52 = vadd.f32 %v547_v49, %v528_v51 }
  0xdb   : > { %v574_v50 = vadd.f32 %v565_v48, %v289_v46 }
  0xdd   : > { %578 = vst [vmem:[#allocation2 + $0x10] sm:$0xff] %v574_v50 }
  0xde   : > { %v533_v1 = vpop.f32.mrf.mxu3 }
  0xe0   : > { %v566_v54 = vpop.f32.mrf.mxu2 }
  0xe1   : > { %v567_v55 = vadd.f32 %v566_v54, %v548_v52  ;;  %v550_v56 = vpop.f32.mrf.mxu1 }
  0xe2   : > { %v551_v59 = vadd.f32 %v550_v56, %v531_v58 }
  0xe3   : > { %v575_v57 = vadd.f32 %v567_v55, %v290_v53 }
  0xe5   : > { %579 = vst [vmem:[#allocation2] sm:$0xff] %v575_v57 }
  0xe8   : > { %v569_v61 = vpop.f32.mrf.mxu2 }
  0xe9   : > { %v570_v62 = vadd.f32 %v569_v61, %v551_v59  ;;  %v552_v0 = vpop.f32.mrf.mxu1 }
  0xea   : > { %v553_v2 = vadd.f32 %v552_v0, %v533_v1 }
  0xeb   : > { %v576_v63 = vadd.f32 %v570_v62, %v291_v60 }
  0xed   : > { %580 = vst [vmem:[#allocation2 + $0x18] sm:$0xff] %v576_v63 }
  0xf0   : > { %v571_v4 = vpop.f32.mrf.mxu2 }
  0xf1   : > { %v572_v5 = vadd.f32 %v571_v4, %v553_v2  ;;  %585 = sbr.rel (%p859_p0) target bundleno = 260 (0x104), region = 48 }
  0xf3   : > { %v577_v6 = vadd.f32 %v572_v5, %v292_v3 }
  0xf5   : > { %581 = vst [vmem:[#allocation2 + $0x8] sm:$0xff] %v577_v6 }
  0xf6   : > { %v586_v7 = vld [vmem:[#allocation2 + $0x10] sm:$0xff]  ;;  %v587_v8 = vld [vmem:[#allocation2] sm:$0xff]  ;;  %v588_v10 = vld [vmem:[#allocation2 + $0x18] sm:$0xff] }
  0xf7   : > { %v994_v9 = vld [vmem:[%s1325_s2] ss:$0 sm:$0xff] }
  0xf8   : > { %v594_v12 = vadd.f32 %v994_v9, %v586_v7  ;;  %v595_v13 = vadd.f32 %v994_v9, %v587_v8  ;;  %v596_v14 = vadd.f32 %v994_v9, %v588_v10 }
  0xfa   : > { %v598_v16 = vmax.f32 %v594_v12, 0.0  ;;  %v599_v17 = vmax.f32 %v595_v13, 0.0  ;;  %v600_v18 = vmax.f32 %v596_v14, 0.0 }
  0xfc   : > { %v589_v11 = vld [vmem:[#allocation2 + $0x8] sm:$0xff]  ;;  %v899_v20 = vpack.c.bf16 %v599_v17, %v598_v16 }
  0xfd   : > { %v597_v15 = vadd.f32 %v994_v9, %v589_v11 }
  0xfe   : > { %900 = vst [vmem:[#allocation8] sm:$0xff] %v899_v20  }
  0xff   : > { %v601_v19 = vmax.f32 %v597_v15, 0.0 }
 0x101   : > { %v904_v21 = vpack.c.bf16 %v601_v19, %v600_v18 }
 0x103   : > { %906 = vst [vmem:[#allocation8 + $0x8] sm:$0xff] %v904_v21  }
 0x104 PF: > { %s1330_s15 = sadd.s32 4294967295, %s1141_s17   ;;  %s621_s12 = sshll.u32 %s1326_s3, 4  ;;  %s622_s12 = int_to_ptr.hbm [resolvable:$true] %s621_s12 }
 0x105   : > { %p935_p1 = scmp.eq.s32.totalorder %s1330_s15, 2  ;;  %s1149_s20 = smov [#allocation8]  }
 0x106   : > { %s619_s21 = sshll.u32 %s1149_s20, 4  ;;  %s1150_s25 = smov 64   ;;  %s620_s21 = int_to_ptr.vmem [resolvable:$true] %s619_s21 }
 0x107   : > { %s1151_s26 = smov 4  }
 0x108   : > { %924 = dma.vmem_to_hbm [thread:$0]  (%p935_p1), %s620_s21, 256, %s622_s12, [#allocation5], %s1150_s25, %s1150_s25, %s1151_s26  }
 0x109   : > { %1116 = dma.done.wait (%p935_p1), [#allocation5], 256  }
 0x10a   : > { %1118 = vsyncadd (%p935_p1), [#allocation5], 4294967040 }
 0x10b PF: > { %s20_s17 = sadd.s32 1, %s1141_s17   ;;  %s1331_s12 = smov %s1125_s13 }
 0x10c   : > { %p17_p2 = scmp.ge.s32.totalorder %s20_s17, 5   ;;  %s1332_s13 = smov %s1129_s14 }
 0x10d   : > { %s1333_s14 = smov %s1219_s23  ;;  %s1334_s15 = smov %s1137_s16 }
 0x10e   : > { %s1335_s16 = smov %s1337_s19  ;;  %19 = sbr.rel (!%p17_p2) target bundleno = 7 (0x7), region = 94 }
 0x113   :  { %638 = vsyncpa [#allocation4], 1 }
 0x114   :  { %640 = vsyncpa [#allocation4 + $0x1], 1 }
 0x115   :  { %641 = vsyncpa [#allocation7], 1 }
 0x116   :  { %643 = vsyncpa [#allocation7 + $0x1], 1 }
 0x117   :  { %644 = vsyncpa [#allocation5], 1 }
 0x118   :  { %646 = vsyncpa [#allocation5 + $0x1], 1 }

</bundles_post_ra>
